<compile_context>
chip_gen: v5e
topology: v5e:2x2
jax: 0.10.0
libtpu: 0.0.40
codegen_flags: <defaults>
</compile_context>

<pallas_src>
import functools

import jax
import jax.numpy as jnp
import numpy as np
from jax.experimental import pallas as pl
from jax.experimental.pallas import tpu as pltpu


# ----------------------------------------------------------------------------
# Kernel A: LSTM stack (one time step) + attention + context
# ----------------------------------------------------------------------------
def _lstm_attn_kernel(num_layers, hidden_dim, *refs):
    L, H = num_layers, hidden_dim
    n_in = 5 + 3 * L + 4
    in_refs = refs[:n_in]
    h_out_ref, c_out_ref, attn_out_ref, comb_out_ref = refs[n_in:]

    emb_ref, h_ref, c_ref, enc_ref, maskb_ref = in_refs[:5]
    lstm_refs = in_refs[5:5 + 3 * L]
    wa_h_ref, wa_e_ref, ba_ref, v_ref = in_refs[5 + 3 * L:]

    # ---------------- LSTM stack (single time step) ----------------
    x = emb_ref[...]                                       # (B, E) f32
    for l in range(L):
        w_ih_t = lstm_refs[3 * l][...]                     # (in_dim, 4H) bf16 (pre-transposed)
        w_hh_t = lstm_refs[3 * l + 1][...]                 # (H, 4H)      bf16 (pre-transposed)
        bias = lstm_refs[3 * l + 2][...]                   # (1, 4H)      f32  (b_ih + b_hh folded)
        h_prev = h_ref[l, :, :]                            # (B, H) f32
        c_prev = c_ref[l, :, :]                            # (B, H) f32

        gates = (jnp.dot(x.astype(w_ih_t.dtype), w_ih_t,
                         preferred_element_type=jnp.float32)
                 + jnp.dot(h_prev.astype(w_hh_t.dtype), w_hh_t,
                           preferred_element_type=jnp.float32)
                 + bias)                                   # (B, 4H) f32, gate order i,f,g,o

        i_g = jax.nn.sigmoid(gates[:, 0 * H:1 * H])
        f_g = jax.nn.sigmoid(gates[:, 1 * H:2 * H])
        g_g = jnp.tanh(gates[:, 2 * H:3 * H])
        o_g = jax.nn.sigmoid(gates[:, 3 * H:4 * H])

        c_new = f_g * c_prev + i_g * g_g
        h_new = o_g * jnp.tanh(c_new)

        h_out_ref[l, :, :] = h_new
        c_out_ref[l, :, :] = c_new
        x = h_new
        # TODO(synk): nn.LSTM inter-layer dropout is training-only; omitted (eval semantics).

    h_top = x                                              # (B, H) == lstm_output[:, 0, :]

    # ---------------- attention ----------------
    enc = enc_ref[...]                                     # (B, S, H) f32
    B, S, _ = enc.shape
    wa_h = wa_h_ref[...]                                   # (H, H) bf16, acts on repeated hidden
    wa_e = wa_e_ref[...]                                   # (H, H) bf16, acts on encoder outputs

    # attn(cat([hidden_rep, enc], -1)) split into two matmuls (no explicit concat).
    h_part = jnp.dot(h_top.astype(wa_h.dtype), wa_h,
                     preferred_element_type=jnp.float32)                       # (B, H)
    e_part = jnp.dot(enc.reshape(B * S, H).astype(wa_e.dtype), wa_e,
                     preferred_element_type=jnp.float32).reshape(B, S, H)      # (B, S, H)
    energy = jnp.tanh(h_part[:, None, :] + e_part + ba_ref[...])               # (B, S, H)
    score = jnp.sum(energy * v_ref[...], axis=2)                               # (B, S)
    score = score + maskb_ref[...]         # additive mask bias (0 / -1e10), built once per batch

    m = jnp.max(score, axis=1, keepdims=True)
    e = jnp.exp(score - m)
    attn = e / jnp.sum(e, axis=1, keepdims=True)           # (B, S) softmax over src
    attn_out_ref[...] = attn

    # context = bmm(attn.unsqueeze(1), enc).squeeze(1)
    context = jnp.sum(attn[:, :, None] * enc, axis=1)      # (B, H)

    # combined = cat([h_top, context], -1) — consumed by the gridded fc kernel.
    comb_out_ref[:, :H] = h_top
    comb_out_ref[:, H:] = context


# ----------------------------------------------------------------------------
# Kernel B: output projection, one vocab tile per grid step
# ----------------------------------------------------------------------------
def _fc_kernel(comb_ref, wf_ref, bf_ref, pred_ref):
    comb = comb_ref[...]                                   # (B, 2H) f32, resident across grid
    pred_ref[...] = (jnp.dot(comb.astype(wf_ref.dtype), wf_ref[...],
                             preferred_element_type=jnp.float32)
                     + bf_ref[...])                        # (B, TV)


# ----------------------------------------------------------------------------
# Parameter preparation (done once, not per decode step)
# ----------------------------------------------------------------------------
def prepare_decoder_params(params, weight_dtype=jnp.bfloat16):
    """Pre-transpose large weights, cast them to `weight_dtype`, fold biases."""
    H = params["attn_w"].shape[0]
    prep = {"embedding": params["embedding"].astype(jnp.float32), "lstm": []}
    for p in params["lstm"]:
        prep["lstm"].append({
            "w_ih_t": p["w_ih"].T.astype(weight_dtype),            # (in_dim, 4H)
            "w_hh_t": p["w_hh"].T.astype(weight_dtype),            # (H, 4H)
            "b": (p["b_ih"] + p["b_hh"]).reshape(1, -1).astype(jnp.float32),
        })
    prep["wa_h_t"] = params["attn_w"][:, :H].T.astype(weight_dtype)  # (H, H)
    prep["wa_e_t"] = params["attn_w"][:, H:].T.astype(weight_dtype)  # (H, H)
    prep["attn_b"] = params["attn_b"].reshape(1, -1).astype(jnp.float32)
    prep["v_w"] = params["v_w"].astype(jnp.float32)                  # (1, H), stays f32
    prep["fc_w_t"] = params["fc_w"].T.astype(weight_dtype)           # (2H, V)
    prep["fc_b"] = params["fc_b"].reshape(1, -1).astype(jnp.float32)
    return prep


def make_src_mask_bias(src_mask):
    """int mask -> additive f32 bias, reusable across all decode steps of a batch."""
    return jnp.where(src_mask == 0, jnp.float32(-1e10), jnp.float32(0.0))


def _vmem_limit(nbytes_estimate):
    # 2x headroom + margin, clamped to what exists on every generation (v7x: 64 MiB/TC).
    return int(min(max(2 * nbytes_estimate + (2 << 20), 16 << 20), 64 << 20))


# ----------------------------------------------------------------------------
# Forward wrapper
# ----------------------------------------------------------------------------
def decoder_forward(prep, x, hidden, cell, encoder_outputs, mask_bias):
    L, B, H = hidden.shape
    S = encoder_outputs.shape[1]
    V = prep["fc_w_t"].shape[1]

    # Embedding gather stays outside the kernel (small glue; kernel gets (B, E)).
    embedded = jnp.take(prep["embedding"], x[:, 0], axis=0)

    # TODO(synk): production H/4H should be padded to a multiple of 128 (and B to a
    # multiple of 8) so gate slices & enc reshapes are (8,128)-tile aligned; the toy
    # H=32 case relies on full-dim blocks instead.

    # ---------------- call A: LSTM + attention + context ----------------
    a_inputs = [embedded, hidden, cell, encoder_outputs, mask_bias]
    for l in range(L):
        p = prep["lstm"][l]
        a_inputs += [p["w_ih_t"], p["w_hh_t"], p["b"]]
    a_inputs += [prep["wa_h_t"], prep["wa_e_t"], prep["attn_b"], prep["v_w"]]

    a_out_shape = (
        jax.ShapeDtypeStruct((L, B, H), jnp.float32),   # new hidden
        jax.ShapeDtypeStruct((L, B, H), jnp.float32),   # new cell
        jax.ShapeDtypeStruct((B, S), jnp.float32),      # attention weights
        jax.ShapeDtypeStruct((B, 2 * H), jnp.float32),  # cat([h_top, context])
    )
    vmem = pl.BlockSpec(memory_space=pltpu.MemorySpace.VMEM)
    a_bytes = sum(int(np.prod(t.shape)) * jnp.dtype(t.dtype).itemsize for t in a_inputs)
    a_bytes += sum(int(np.prod(s.shape)) * jnp.dtype(s.dtype).itemsize for s in a_out_shape)

    h_new, c_new, attn, combined = pl.pallas_call(
        functools.partial(_lstm_attn_kernel, L, H),
        out_shape=a_out_shape,
        in_specs=[vmem] * len(a_inputs),
        out_specs=tuple([vmem] * 4),
        compiler_params=pltpu.CompilerParams(vmem_limit_bytes=_vmem_limit(a_bytes)),
    )(*a_inputs)

    # ---------------- call B: output projection, gridded over V ----------------
    wdt = prep["fc_w_t"].dtype
    TV = V if V <= 1024 else 1024          # full dim for small V, else a 128-multiple tile
    grid = (pl.cdiv(V, TV),)
    b_bytes = (B * 2 * H * 4
               + 2 * (2 * H * TV * jnp.dtype(wdt).itemsize + TV * 4 + B * TV * 4))

    pred = pl.pallas_call(
        _fc_kernel,
        out_shape=jax.ShapeDtypeStruct((B, V), jnp.float32),
        grid=grid,
        in_specs=[
            pl.BlockSpec((B, 2 * H), lambda j: (0, 0)),    # combined, resident across grid
            pl.BlockSpec((2 * H, TV), lambda j: (0, j)),   # fc weight tile (pre-transposed)
            pl.BlockSpec((1, TV), lambda j: (0, j)),       # fc bias tile
        ],
        out_specs=pl.BlockSpec((B, TV), lambda j: (0, j)),
        compiler_params=pltpu.CompilerParams(
            dimension_semantics=("parallel",),             # v7x: shard V tiles across 2 TCs
            vmem_limit_bytes=_vmem_limit(b_bytes)),
    )(combined, prep["fc_w_t"], prep["fc_b"])

    # TODO(synk): with B=2 the MXU is <2% utilized and each decode step re-streams
    # the weights; fusing multiple decode streams/steps per call is the next lever.
    return pred[:, None, :], h_new, c_new, attn


# ----------------------------------------------------------------------------
# Pure-JAX reference (mirrors the PyTorch forward).  weight_dtype=bfloat16 rounds
# weights and matmul inputs the same way the kernel's MXU path does (f32 accum).
# ----------------------------------------------------------------------------
def decoder_reference(params, x, hidden, cell, enc, mask, weight_dtype=jnp.float32):
    def wcast(w):
        return w.astype(weight_dtype).astype(jnp.float32)

    def acast(a):
        return a.astype(weight_dtype).astype(jnp.float32)

    L, B, H = hidden.shape
    emb = params["embedding"][x[:, 0]]
    inp = emb
    h_list, c_list = [], []
    for l in range(L):
        p = params["lstm"][l]
        gates = (acast(inp) @ wcast(p["w_ih"]).T + acast(hidden[l]) @ wcast(p["w_hh"]).T
                 + p["b_ih"] + p["b_hh"])
        i = jax.nn.sigmoid(gates[:, :H])
        f = jax.nn.sigmoid(gates[:, H:2 * H])
        g = jnp.tanh(gates[:, 2 * H:3 * H])
        o = jax.nn.sigmoid(gates[:, 3 * H:])
        c = f * cell[l] + i * g
        h = o * jnp.tanh(c)
        h_list.append(h); c_list.append(c)
        inp = h
    h_new = jnp.stack(h_list); c_new = jnp.stack(c_list)
    h_top = h_new[-1]
    S = enc.shape[1]
    hid_rep = jnp.repeat(h_top[:, None, :], S, axis=1)
    cat = jnp.concatenate([hid_rep, enc], axis=2)
    energy = jnp.tanh(acast(cat) @ wcast(params["attn_w"]).T + params["attn_b"])
    score = (energy @ params["v_w"].T)[..., 0]
    score = jnp.where(mask == 0, -1e10, score)
    attn = jax.nn.softmax(score, axis=1)
    context = jnp.einsum("bs,bsh->bh", attn, enc)
    combined = jnp.concatenate([h_top, context], axis=-1)
    pred = acast(combined) @ wcast(params["fc_w"]).T + params["fc_b"]
    return pred[:, None, :], h_new, c_new, attn


def init_params(key, vocab_size, embedding_dim, hidden_dim, num_layers):
    ks = jax.random.split(key, 6 + 4 * num_layers)
    it = iter(ks)

    def unif(k, shape, fan_in):
        bound = 1.0 / np.sqrt(fan_in)
        return jax.random.uniform(k, shape, jnp.float32, -bound, bound)

    params = {
        "embedding": jax.random.normal(next(it), (vocab_size, embedding_dim), jnp.float32),
        "lstm": [],
    }
    for l in range(num_layers):
        in_dim = embedding_dim if l == 0 else hidden_dim
        params["lstm"].append({
            "w_ih": unif(next(it), (4 * hidden_dim, in_dim), hidden_dim),
            "w_hh": unif(next(it), (4 * hidden_dim, hidden_dim), hidden_dim),
            "b_ih": unif(next(it), (4 * hidden_dim,), hidden_dim),
            "b_hh": unif(next(it), (4 * hidden_dim,), hidden_dim),
        })
    params["attn_w"] = unif(next(it), (hidden_dim, 2 * hidden_dim), 2 * hidden_dim)
    params["attn_b"] = unif(next(it), (hidden_dim,), 2 * hidden_dim)
    params["v_w"] = unif(next(it), (1, hidden_dim), hidden_dim)
    params["fc_w"] = unif(next(it), (vocab_size, 2 * hidden_dim), 2 * hidden_dim)
    params["fc_b"] = unif(next(it), (vocab_size,), 2 * hidden_dim)
    return params


if __name__ == "__main__":
    # small shapes consistent with the module
    B, S, H, E, V, L = 2, 8, 32, 16, 24, 2

    key = jax.random.PRNGKey(0)
    kp, kx, kh, kc, ke = jax.random.split(key, 5)

    params = init_params(kp, V, E, H, L)

    x = jax.random.randint(kx, (B, 1), 0, V, dtype=jnp.int32)          # token ids
    hidden = jax.random.normal(kh, (L, B, H), jnp.float32)
    cell = jax.random.normal(kc, (L, B, H), jnp.float32)
    encoder_outputs = jax.random.normal(ke, (B, S, H), jnp.float32)
    src_lens = jnp.array([6, 8], dtype=jnp.int32)
    src_mask = (jnp.arange(S)[None, :] < src_lens[:, None]).astype(jnp.int32)

    weight_dtype = jnp.bfloat16
    prep = prepare_decoder_params(params, weight_dtype)     # one-time param prep
    mask_bias = make_src_mask_bias(src_mask)                 # one-time per batch

    run = jax.jit(decoder_forward)
    pred, h_new, c_new, attn = run(prep, x, hidden, cell, encoder_outputs, mask_bias)
    jax.block_until_ready((pred, h_new, c_new, attn))

    # (1) tight check vs a precision-matched reference (bf16 weights/matmul inputs,
    #     f32 accumulation — the same math the kernel performs on the MXU).
    ref_m = decoder_reference(params, x, hidden, cell, encoder_outputs, src_mask,
                              weight_dtype=weight_dtype)
    for got, want in zip((pred, h_new, c_new, attn), ref_m):
        np.testing.assert_allclose(np.asarray(got), np.asarray(want), rtol=1e-3, atol=1e-3)

    # (2) loose sanity check vs the exact f32 PyTorch-semantics reference
    #     (weights are stored bf16 in the kernel, so tolerances are widened).
    ref_f = decoder_reference(params, x, hidden, cell, encoder_outputs, src_mask,
                              weight_dtype=jnp.float32)
    for got, want in zip((pred, h_new, c_new, attn), ref_f):
        np.testing.assert_allclose(np.asarray(got), np.asarray(want), rtol=5e-2, atol=5e-2)

    print("KERNEL_OK")
</pallas_src>

<mosaic_0001>
module attributes {stable_mosaic.version = 11 : i64} {
  func.func @_fc_kernel(%arg0: i32, %arg1: memref<2x64xf32, #tpu.memory_space<vmem>>, %arg2: memref<64x24xbf16, #tpu.memory_space<vmem>>, %arg3: memref<1x24xf32, #tpu.memory_space<vmem>>, %arg4: memref<2x24xf32, #tpu.memory_space<vmem>>) attributes {dimension_semantics = [#tpu.dimension_semantics<parallel>], iteration_bounds = array<i64: 1>, scalar_prefetch = 0 : i64, scratch_operands = 0 : i64, tpu.core_type = #tpu.core_type<tc>, window_params = [{pipeline_mode = #tpu.pipeline_mode<synchronous>, transform_indices = @transform_0, window_bounds = array<i64: 2, 64>}, {transform_indices = @transform_1, window_bounds = array<i64: 64, 24>}, {transform_indices = @transform_2, window_bounds = array<i64: 1, 24>}, {transform_indices = @transform_3, window_bounds = array<i64: 2, 24>}]} {
    %c0 = arith.constant 0 : index
    %c0_0 = arith.constant 0 : index
    %0 = vector.load %arg1[%c0, %c0_0] : memref<2x64xf32, #tpu.memory_space<vmem>>, vector<2x64xf32>
    %1 = arith.truncf %0 : vector<2x64xf32> to vector<2x64xbf16>
    %c0_1 = arith.constant 0 : index
    %c0_2 = arith.constant 0 : index
    %2 = vector.load %arg2[%c0_1, %c0_2] : memref<64x24xbf16, #tpu.memory_space<vmem>>, vector<64x24xbf16>
    %cst = arith.constant dense<0.000000e+00> : vector<2x24xf32>
    %3 = tpu.matmul %1, %2, %cst {dimension_numbers = #tpu.dot_dimension_numbers<[1], [0], [0], [1], [0, 0, 1, 1], [], []>} : vector<2x64xbf16>, vector<64x24xbf16>, vector<2x24xf32> -> vector<2x24xf32>
    %c0_3 = arith.constant 0 : index
    %c0_4 = arith.constant 0 : index
    %4 = vector.load %arg3[%c0_3, %c0_4] : memref<1x24xf32, #tpu.memory_space<vmem>>, vector<1x24xf32>
    %5 = vector.broadcast %4 : vector<1x24xf32> to vector<2x24xf32>
    %6 = arith.addf %3, %5 : vector<2x24xf32>
    %c0_5 = arith.constant 0 : index
    %c0_6 = arith.constant 0 : index
    %7 = vector.load %arg4[%c0_5, %c0_6] : memref<2x24xf32, #tpu.memory_space<vmem>>, vector<2x24xf32>
    tpu.vector_store %arg4[%c0_5, %c0_6], %6 {strides = array<i32>} : memref<2x24xf32, #tpu.memory_space<vmem>>, vector<2x24xf32>,
    return
  }
  func.func @transform_0(%arg0: i32) -> (i32, i32) {
    %c0_i32 = arith.constant 0 : i32
    %c0_i32_0 = arith.constant 0 : i32
    %c0_i32_1 = arith.constant 0 : i32
    return %c0_i32, %c0_i32_0 : i32, i32
  }
  func.func @transform_1(%arg0: i32) -> (i32, i32) {
    %c0_i32 = arith.constant 0 : i32
    %c0_i32_0 = arith.constant 0 : i32
    return %c0_i32, %arg0 : i32, i32
  }
  func.func @transform_2(%arg0: i32) -> (i32, i32) {
    %c0_i32 = arith.constant 0 : i32
    %c0_i32_0 = arith.constant 0 : i32
    return %c0_i32, %arg0 : i32, i32
  }
  func.func @transform_3(%arg0: i32) -> (i32, i32) {
    %c0_i32 = arith.constant 0 : i32
    %c0_i32_0 = arith.constant 0 : i32
    return %c0_i32, %arg0 : i32, i32
  }
}

module attributes {stable_mosaic.version = 11 : i64} {
  func.func @_lstm_attn_kernel(%arg0: memref<2x16xf32, #tpu.memory_space<vmem>>, %arg1: memref<2x2x32xf32, #tpu.memory_space<vmem>>, %arg2: memref<2x2x32xf32, #tpu.memory_space<vmem>>, %arg3: memref<2x8x32xf32, #tpu.memory_space<vmem>>, %arg4: memref<2x8xf32, #tpu.memory_space<vmem>>, %arg5: memref<16x128xbf16, #tpu.memory_space<vmem>>, %arg6: memref<32x128xbf16, #tpu.memory_space<vmem>>, %arg7: memref<1x128xf32, #tpu.memory_space<vmem>>, %arg8: memref<32x128xbf16, #tpu.memory_space<vmem>>, %arg9: memref<32x128xbf16, #tpu.memory_space<vmem>>, %arg10: memref<1x128xf32, #tpu.memory_space<vmem>>, %arg11: memref<32x32xbf16, #tpu.memory_space<vmem>>, %arg12: memref<32x32xbf16, #tpu.memory_space<vmem>>, %arg13: memref<1x32xf32, #tpu.memory_space<vmem>>, %arg14: memref<1x32xf32, #tpu.memory_space<vmem>>, %arg15: memref<2x2x32xf32, #tpu.memory_space<vmem>>, %arg16: memref<2x2x32xf32, #tpu.memory_space<vmem>>, %arg17: memref<2x8xf32, #tpu.memory_space<vmem>>, %arg18: memref<2x64xf32, #tpu.memory_space<vmem>>) attributes {dimension_semantics = [], scalar_prefetch = 0 : i64, scratch_operands = 0 : i64, tpu.core_type = #tpu.core_type<tc>} {
    %c0 = arith.constant 0 : index
    %c0_0 = arith.constant 0 : index
    %0 = vector.load %arg0[%c0, %c0_0] : memref<2x16xf32, #tpu.memory_space<vmem>>, vector<2x16xf32>
    %c0_1 = arith.constant 0 : index
    %c0_2 = arith.constant 0 : index
    %1 = vector.load %arg5[%c0_1, %c0_2] : memref<16x128xbf16, #tpu.memory_space<vmem>>, vector<16x128xbf16>
    %c0_3 = arith.constant 0 : index
    %c0_4 = arith.constant 0 : index
    %2 = vector.load %arg6[%c0_3, %c0_4] : memref<32x128xbf16, #tpu.memory_space<vmem>>, vector<32x128xbf16>
    %c0_5 = arith.constant 0 : index
    %c0_6 = arith.constant 0 : index
    %3 = vector.load %arg7[%c0_5, %c0_6] : memref<1x128xf32, #tpu.memory_space<vmem>>, vector<1x128xf32>
    %c0_7 = arith.constant 0 : index
    %c0_8 = arith.constant 0 : index
    %c0_9 = arith.constant 0 : index
    %4 = vector.load %arg1[%c0_7, %c0_8, %c0_9] : memref<2x2x32xf32, #tpu.memory_space<vmem>>, vector<1x2x32xf32>
    %5 = vector.shape_cast %4 : vector<1x2x32xf32> to vector<2x32xf32>
    %c0_10 = arith.constant 0 : index
    %c0_11 = arith.constant 0 : index
    %c0_12 = arith.constant 0 : index
    %6 = vector.load %arg2[%c0_10, %c0_11, %c0_12] : memref<2x2x32xf32, #tpu.memory_space<vmem>>, vector<1x2x32xf32>
    %7 = vector.shape_cast %6 : vector<1x2x32xf32> to vector<2x32xf32>
    %8 = arith.truncf %0 : vector<2x16xf32> to vector<2x16xbf16>
    %cst = arith.constant dense<0.000000e+00> : vector<2x128xf32>
    %9 = tpu.matmul %8, %1, %cst {dimension_numbers = #tpu.dot_dimension_numbers<[1], [0], [0], [1], [0, 0, 1, 1], [], []>} : vector<2x16xbf16>, vector<16x128xbf16>, vector<2x128xf32> -> vector<2x128xf32>
    %10 = arith.truncf %5 : vector<2x32xf32> to vector<2x32xbf16>
    %cst_13 = arith.constant dense<0.000000e+00> : vector<2x128xf32>
    %11 = tpu.matmul %10, %2, %cst_13 {dimension_numbers = #tpu.dot_dimension_numbers<[1], [0], [0], [1], [0, 0, 1, 1], [], []>} : vector<2x32xbf16>, vector<32x128xbf16>, vector<2x128xf32> -> vector<2x128xf32>
    %12 = arith.addf %9, %11 : vector<2x128xf32>
    %13 = vector.broadcast %3 : vector<1x128xf32> to vector<2x128xf32>
    %14 = arith.addf %12, %13 : vector<2x128xf32>
    %15 = vector.extract_strided_slice %14 {offsets = [0, 0], sizes = [2, 32], strides = [1, 1]} : vector<2x128xf32> to vector<2x32xf32>
    %16 = arith.negf %15 : vector<2x32xf32>
    %17 = math.exp %16 : vector<2x32xf32>
    %cst_14 = arith.constant 1.000000e+00 : f32
    %18 = vector.broadcast %cst_14 : f32 to vector<2x32xf32>
    %19 = arith.addf %18, %17 : vector<2x32xf32>
    %20 = arith.divf %18, %19 : vector<2x32xf32>
    %21 = vector.extract_strided_slice %14 {offsets = [0, 32], sizes = [2, 32], strides = [1, 1]} : vector<2x128xf32> to vector<2x32xf32>
    %22 = arith.negf %21 : vector<2x32xf32>
    %23 = math.exp %22 : vector<2x32xf32>
    %cst_15 = arith.constant 1.000000e+00 : f32
    %24 = vector.broadcast %cst_15 : f32 to vector<2x32xf32>
    %25 = arith.addf %24, %23 : vector<2x32xf32>
    %26 = arith.divf %24, %25 : vector<2x32xf32>
    %27 = vector.extract_strided_slice %14 {offsets = [0, 64], sizes = [2, 32], strides = [1, 1]} : vector<2x128xf32> to vector<2x32xf32>
    %28 = math.tanh %27 : vector<2x32xf32>
    %29 = vector.extract_strided_slice %14 {offsets = [0, 96], sizes = [2, 32], strides = [1, 1]} : vector<2x128xf32> to vector<2x32xf32>
    %30 = arith.negf %29 : vector<2x32xf32>
    %31 = math.exp %30 : vector<2x32xf32>
    %cst_16 = arith.constant 1.000000e+00 : f32
    %32 = vector.broadcast %cst_16 : f32 to vector<2x32xf32>
    %33 = arith.addf %32, %31 : vector<2x32xf32>
    %34 = arith.divf %32, %33 : vector<2x32xf32>
    %35 = arith.mulf %26, %7 : vector<2x32xf32>
    %36 = arith.mulf %20, %28 : vector<2x32xf32>
    %37 = arith.addf %35, %36 : vector<2x32xf32>
    %38 = math.tanh %37 : vector<2x32xf32>
    %39 = arith.mulf %34, %38 : vector<2x32xf32>
    %c0_17 = arith.constant 0 : index
    %c0_18 = arith.constant 0 : index
    %c0_19 = arith.constant 0 : index
    %40 = vector.load %arg15[%c0_17, %c0_18, %c0_19] : memref<2x2x32xf32, #tpu.memory_space<vmem>>, vector<1x2x32xf32>
    %41 = vector.shape_cast %40 : vector<1x2x32xf32> to vector<2x32xf32>
    %42 = vector.shape_cast %39 : vector<2x32xf32> to vector<1x2x32xf32>
    tpu.vector_store %arg15[%c0_17, %c0_18, %c0_19], %42 {strides = array<i32>} : memref<2x2x32xf32, #tpu.memory_space<vmem>>, vector<1x2x32xf32>,
    %c0_20 = arith.constant 0 : index
    %c0_21 = arith.constant 0 : index
    %c0_22 = arith.constant 0 : index
    %43 = vector.load %arg16[%c0_20, %c0_21, %c0_22] : memref<2x2x32xf32, #tpu.memory_space<vmem>>, vector<1x2x32xf32>
    %44 = vector.shape_cast %43 : vector<1x2x32xf32> to vector<2x32xf32>
    %45 = vector.shape_cast %37 : vector<2x32xf32> to vector<1x2x32xf32>
    tpu.vector_store %arg16[%c0_20, %c0_21, %c0_22], %45 {strides = array<i32>} : memref<2x2x32xf32, #tpu.memory_space<vmem>>, vector<1x2x32xf32>,
    %c0_23 = arith.constant 0 : index
    %c0_24 = arith.constant 0 : index
    %46 = vector.load %arg8[%c0_23, %c0_24] : memref<32x128xbf16, #tpu.memory_space<vmem>>, vector<32x128xbf16>
    %c0_25 = arith.constant 0 : index
    %c0_26 = arith.constant 0 : index
    %47 = vector.load %arg9[%c0_25, %c0_26] : memref<32x128xbf16, #tpu.memory_space<vmem>>, vector<32x128xbf16>
    %c0_27 = arith.constant 0 : index
    %c0_28 = arith.constant 0 : index
    %48 = vector.load %arg10[%c0_27, %c0_28] : memref<1x128xf32, #tpu.memory_space<vmem>>, vector<1x128xf32>
    %c1 = arith.constant 1 : index
    %c0_29 = arith.constant 0 : index
    %c0_30 = arith.constant 0 : index
    %49 = vector.load %arg1[%c1, %c0_29, %c0_30] : memref<2x2x32xf32, #tpu.memory_space<vmem>>, vector<1x2x32xf32>
    %50 = vector.shape_cast %49 : vector<1x2x32xf32> to vector<2x32xf32>
    %c1_31 = arith.constant 1 : index
    %c0_32 = arith.constant 0 : index
    %c0_33 = arith.constant 0 : index
    %51 = vector.load %arg2[%c1_31, %c0_32, %c0_33] : memref<2x2x32xf32, #tpu.memory_space<vmem>>, vector<1x2x32xf32>
    %52 = vector.shape_cast %51 : vector<1x2x32xf32> to vector<2x32xf32>
    %53 = arith.truncf %39 : vector<2x32xf32> to vector<2x32xbf16>
    %cst_34 = arith.constant dense<0.000000e+00> : vector<2x128xf32>
    %54 = tpu.matmul %53, %46, %cst_34 {dimension_numbers = #tpu.dot_dimension_numbers<[1], [0], [0], [1], [0, 0, 1, 1], [], []>} : vector<2x32xbf16>, vector<32x128xbf16>, vector<2x128xf32> -> vector<2x128xf32>
    %55 = arith.truncf %50 : vector<2x32xf32> to vector<2x32xbf16>
    %cst_35 = arith.constant dense<0.000000e+00> : vector<2x128xf32>
    %56 = tpu.matmul %55, %47, %cst_35 {dimension_numbers = #tpu.dot_dimension_numbers<[1], [0], [0], [1], [0, 0, 1, 1], [], []>} : vector<2x32xbf16>, vector<32x128xbf16>, vector<2x128xf32> -> vector<2x128xf32>
    %57 = arith.addf %54, %56 : vector<2x128xf32>
    %58 = vector.broadcast %48 : vector<1x128xf32> to vector<2x128xf32>
    %59 = arith.addf %57, %58 : vector<2x128xf32>
    %60 = vector.extract_strided_slice %59 {offsets = [0, 0], sizes = [2, 32], strides = [1, 1]} : vector<2x128xf32> to vector<2x32xf32>
    %61 = arith.negf %60 : vector<2x32xf32>
    %62 = math.exp %61 : vector<2x32xf32>
    %cst_36 = arith.constant 1.000000e+00 : f32
    %63 = vector.broadcast %cst_36 : f32 to vector<2x32xf32>
    %64 = arith.addf %63, %62 : vector<2x32xf32>
    %65 = arith.divf %63, %64 : vector<2x32xf32>
    %66 = vector.extract_strided_slice %59 {offsets = [0, 32], sizes = [2, 32], strides = [1, 1]} : vector<2x128xf32> to vector<2x32xf32>
    %67 = arith.negf %66 : vector<2x32xf32>
    %68 = math.exp %67 : vector<2x32xf32>
    %cst_37 = arith.constant 1.000000e+00 : f32
    %69 = vector.broadcast %cst_37 : f32 to vector<2x32xf32>
    %70 = arith.addf %69, %68 : vector<2x32xf32>
    %71 = arith.divf %69, %70 : vector<2x32xf32>
    %72 = vector.extract_strided_slice %59 {offsets = [0, 64], sizes = [2, 32], strides = [1, 1]} : vector<2x128xf32> to vector<2x32xf32>
    %73 = math.tanh %72 : vector<2x32xf32>
    %74 = vector.extract_strided_slice %59 {offsets = [0, 96], sizes = [2, 32], strides = [1, 1]} : vector<2x128xf32> to vector<2x32xf32>
    %75 = arith.negf %74 : vector<2x32xf32>
    %76 = math.exp %75 : vector<2x32xf32>
    %cst_38 = arith.constant 1.000000e+00 : f32
    %77 = vector.broadcast %cst_38 : f32 to vector<2x32xf32>
    %78 = arith.addf %77, %76 : vector<2x32xf32>
    %79 = arith.divf %77, %78 : vector<2x32xf32>
    %80 = arith.mulf %71, %52 : vector<2x32xf32>
    %81 = arith.mulf %65, %73 : vector<2x32xf32>
    %82 = arith.addf %80, %81 : vector<2x32xf32>
    %83 = math.tanh %82 : vector<2x32xf32>
    %84 = arith.mulf %79, %83 : vector<2x32xf32>
    %c1_39 = arith.constant 1 : index
    %c0_40 = arith.constant 0 : index
    %c0_41 = arith.constant 0 : index
    %85 = vector.load %arg15[%c1_39, %c0_40, %c0_41] : memref<2x2x32xf32, #tpu.memory_space<vmem>>, vector<1x2x32xf32>
    %86 = vector.shape_cast %85 : vector<1x2x32xf32> to vector<2x32xf32>
    %87 = vector.shape_cast %84 : vector<2x32xf32> to vector<1x2x32xf32>
    tpu.vector_store %arg15[%c1_39, %c0_40, %c0_41], %87 {strides = array<i32>} : memref<2x2x32xf32, #tpu.memory_space<vmem>>, vector<1x2x32xf32>,
    %c1_42 = arith.constant 1 : index
    %c0_43 = arith.constant 0 : index
    %c0_44 = arith.constant 0 : index
    %88 = vector.load %arg16[%c1_42, %c0_43, %c0_44] : memref<2x2x32xf32, #tpu.memory_space<vmem>>, vector<1x2x32xf32>
    %89 = vector.shape_cast %88 : vector<1x2x32xf32> to vector<2x32xf32>
    %90 = vector.shape_cast %82 : vector<2x32xf32> to vector<1x2x32xf32>
    tpu.vector_store %arg16[%c1_42, %c0_43, %c0_44], %90 {strides = array<i32>} : memref<2x2x32xf32, #tpu.memory_space<vmem>>, vector<1x2x32xf32>,
    %c0_45 = arith.constant 0 : index
    %c0_46 = arith.constant 0 : index
    %c0_47 = arith.constant 0 : index
    %91 = vector.load %arg3[%c0_45, %c0_46, %c0_47] : memref<2x8x32xf32, #tpu.memory_space<vmem>>, vector<2x8x32xf32>
    %c0_48 = arith.constant 0 : index
    %c0_49 = arith.constant 0 : index
    %92 = vector.load %arg11[%c0_48, %c0_49] : memref<32x32xbf16, #tpu.memory_space<vmem>>, vector<32x32xbf16>
    %c0_50 = arith.constant 0 : index
    %c0_51 = arith.constant 0 : index
    %93 = vector.load %arg12[%c0_50, %c0_51] : memref<32x32xbf16, #tpu.memory_space<vmem>>, vector<32x32xbf16>
    %94 = arith.truncf %84 : vector<2x32xf32> to vector<2x32xbf16>
    %cst_52 = arith.constant dense<0.000000e+00> : vector<2x32xf32>
    %95 = tpu.matmul %94, %92, %cst_52 {dimension_numbers = #tpu.dot_dimension_numbers<[1], [0], [0], [1], [0, 0, 1, 1], [], []>} : vector<2x32xbf16>, vector<32x32xbf16>, vector<2x32xf32> -> vector<2x32xf32>
    %96 = vector.shape_cast %91 : vector<2x8x32xf32> to vector<16x32xf32>
    %97 = arith.truncf %96 : vector<16x32xf32> to vector<16x32xbf16>
    %cst_53 = arith.constant dense<0.000000e+00> : vector<16x32xf32>
    %98 = tpu.matmul %97, %93, %cst_53 {dimension_numbers = #tpu.dot_dimension_numbers<[1], [0], [0], [1], [0, 0, 1, 1], [], []>} : vector<16x32xbf16>, vector<32x32xbf16>, vector<16x32xf32> -> vector<16x32xf32>
    %99 = vector.shape_cast %98 : vector<16x32xf32> to vector<2x8x32xf32>
    %100 = vector.shape_cast %95 : vector<2x32xf32> to vector<2x1x32xf32>
    %101 = vector.broadcast %100 : vector<2x1x32xf32> to vector<2x8x32xf32>
    %102 = arith.addf %101, %99 : vector<2x8x32xf32>
    %c0_54 = arith.constant 0 : index
    %c0_55 = arith.constant 0 : index
    %103 = vector.load %arg13[%c0_54, %c0_55] : memref<1x32xf32, #tpu.memory_space<vmem>>, vector<1x32xf32>
    %104 = vector.shape_cast %103 : vector<1x32xf32> to vector<1x1x32xf32>
    %105 = vector.broadcast %104 : vector<1x1x32xf32> to vector<2x8x32xf32>
    %106 = arith.addf %102, %105 : vector<2x8x32xf32>
    %107 = math.tanh %106 : vector<2x8x32xf32>
    %c0_56 = arith.constant 0 : index
    %c0_57 = arith.constant 0 : index
    %108 = vector.load %arg14[%c0_56, %c0_57] : memref<1x32xf32, #tpu.memory_space<vmem>>, vector<1x32xf32>
    %109 = vector.shape_cast %108 : vector<1x32xf32> to vector<1x1x32xf32>
    %110 = vector.broadcast %109 : vector<1x1x32xf32> to vector<2x8x32xf32>
    %111 = arith.mulf %107, %110 : vector<2x8x32xf32>
    %cst_58 = arith.constant dense<0.000000e+00> : vector<2x8xf32>
    %112 = vector.multi_reduction <add>, %111, %cst_58 [2] : vector<2x8x32xf32> to vector<2x8xf32>
    %c0_59 = arith.constant 0 : index
    %c0_60 = arith.constant 0 : index
    %113 = vector.load %arg4[%c0_59, %c0_60] : memref<2x8xf32, #tpu.memory_space<vmem>>, vector<2x8xf32>
    %114 = arith.addf %112, %113 : vector<2x8xf32>
    %cst_61 = arith.constant dense<0xFF800000> : vector<2xf32>
    %115 = vector.multi_reduction <maximumf>, %114, %cst_61 [1] : vector<2x8xf32> to vector<2xf32>
    %116 = vector.shape_cast %115 : vector<2xf32> to vector<2x1xf32>
    %117 = vector.broadcast %116 : vector<2x1xf32> to vector<2x8xf32>
    %118 = arith.subf %114, %117 : vector<2x8xf32>
    %119 = math.exp %118 : vector<2x8xf32>
    %cst_62 = arith.constant dense<0.000000e+00> : vector<2xf32>
    %120 = vector.multi_reduction <add>, %119, %cst_62 [1] : vector<2x8xf32> to vector<2xf32>
    %121 = vector.shape_cast %120 : vector<2xf32> to vector<2x1xf32>
    %122 = vector.broadcast %121 : vector<2x1xf32> to vector<2x8xf32>
    %123 = arith.divf %119, %122 : vector<2x8xf32>
    %c0_63 = arith.constant 0 : index
    %c0_64 = arith.constant 0 : index
    %124 = vector.load %arg17[%c0_63, %c0_64] : memref<2x8xf32, #tpu.memory_space<vmem>>, vector<2x8xf32>
    tpu.vector_store %arg17[%c0_63, %c0_64], %123 {strides = array<i32>} : memref<2x8xf32, #tpu.memory_space<vmem>>, vector<2x8xf32>,
    %125 = vector.shape_cast %123 : vector<2x8xf32> to vector<2x8x1xf32>
    %126 = vector.broadcast %125 : vector<2x8x1xf32> to vector<2x8x32xf32>
    %127 = arith.mulf %126, %91 : vector<2x8x32xf32>
    %cst_65 = arith.constant dense<0.000000e+00> : vector<2x32xf32>
    %128 = vector.multi_reduction <add>, %127, %cst_65 [1] : vector<2x8x32xf32> to vector<2x32xf32>
    %c0_66 = arith.constant 0 : index
    %c0_67 = arith.constant 0 : index
    %129 = vector.load %arg18[%c0_66, %c0_67] : memref<2x64xf32, #tpu.memory_space<vmem>>, vector<2x32xf32>
    tpu.vector_store %arg18[%c0_66, %c0_67], %84 {strides = array<i32>} : memref<2x64xf32, #tpu.memory_space<vmem>>, vector<2x32xf32>,
    %c0_68 = arith.constant 0 : index
    %c32 = arith.constant 32 : index
    %130 = vector.load %arg18[%c0_68, %c32] : memref<2x64xf32, #tpu.memory_space<vmem>>, vector<2x32xf32>
    tpu.vector_store %arg18[%c0_68, %c32], %128 {strides = array<i32>} : memref<2x64xf32, #tpu.memory_space<vmem>>, vector<2x32xf32>,
    return
  }
}

</mosaic_0001>

<bundles_post_ra>
// kernel: decoder_forward.3
= control target key start
LH: loop header
LB: loop body
LE: loop exit
PB: predicated region body
PF: predicated region fallthrough
CT: control target
= control target key end

     0   :  { %s180_s0 = inlined_call_operand.vmem [shape: f32[2,64], index: 0, kind: input, shape index: {}]   ;;  %s181_s1 = inlined_call_operand.vmem [shape: bf16[64,24], index: 1, kind: input, shape index: {}]   ;;  %s182_s2 = inlined_call_operand.vmem [shape: f32[1,24], index: 2, kind: input, shape index: {}]   ;;  %s183_s3 = inlined_call_operand.hbm [shape: f32[2,24], index: 3, kind: output, shape index: {}]  }
   0x1   :  { %v109_v0 = vld [vmem:[%s181_s1 + $0x18] sm:$0xff]  ;;  %v108_v1 = vld [vmem:[%s181_s1 + $0x10] sm:$0xff] }
   0x2   :  { %62 = vmatpush.bf16.msra.mxu0 %v109_v0 }
   0x3   :  { %8 = vsyncpa [#allocation3], 0  ;;  %v107_v2 = vld [vmem:[%s181_s1 + $0x8] sm:$0xff]  ;;  %v106_v3 = vld [vmem:[%s181_s1] sm:$0xff]  ;;  %vm54_vm0 = vcmask 523264   ;;  %s138_s24 = smov [#allocation2]  }
   0x4   :  { %v16_v4 = vld [vmem:[%s180_s0] sm:$0x3]  ;;  %s78_s25 = sshll.u32 %s138_s24, 4  ;;  %s80_s28 = sshll.u32 %s183_s3, 4  ;;  %vm71_vm1 = vcmask 189440   ;;  %s79_s25 = int_to_ptr.vmem [resolvable:$true] %s78_s25  ;;  %s81_s28 = int_to_ptr.hbm [resolvable:$true] %s80_s28 }
   0x5   :  { %v17_v5 = vpack.c.bf16 %v16_v4, %v16_v4  ;;  %v111_v6 = vld [vmem:[%s182_s2] ss:$0 sm:$0xff] }
   0x6   :  { %63 = vmatpush.bf16.msra.mxu0 %v108_v1 }
   0xa   :  { %64 = vmatpush.bf16.msra.mxu0 %v107_v2 }
   0xe   :  { %65 = vmatpush.bf16.msra.mxu0 %v106_v3 }
  0x11   :  { %105 = vmatmul.msk.bf16.vlgmr.msra.gmra.mxu0 %vm54_vm0, %v17_v5 }
  0x8e   :  { %v67_v7 = vpop.f32.mrf.mxu0 }
  0x8f   :  { %v68_v8 = vadd.f32 %v111_v6, %v67_v7 }
  0x91   :  { %72 = vst.msk [vmem:[#allocation2] sm:$0x3] %vm71_vm1, %v68_v8 }
  0x92   :  { %83 = dma.vmem_to_hbm [thread:$0]  %s79_s25, 32, %s81_s28, [#allocation3]  }
  0x96   :  { %v69_v9 = vpop.f32.mrf.mxu0 }
  0x97   :  { %136 = dma.done.wait [#allocation3], 32  }
  0x98   :  { %137 = vsyncadd [#allocation3], 4294967264 }
  0x99   :  { %88 = vsyncpa [#allocation3], 1 }

// kernel: decoder_forward.2
= control target key start
LH: loop header
LB: loop body
LE: loop exit
PB: predicated region body
PF: predicated region fallthrough
CT: control target
= control target key end

     0   :  { %s1264_s0 = inlined_call_operand.vmem [shape: f32[2,16], index: 0, kind: input, shape index: {}]   ;;  %s1265_s1 = inlined_call_operand.vmem [shape: f32[2,2,32], index: 1, kind: input, shape index: {}]   ;;  %s1266_s2 = inlined_call_operand.vmem [shape: f32[2,2,32], index: 2, kind: input, shape index: {}]   ;;  %s1267_s3 = inlined_call_operand.vmem [shape: f32[2,8,32], index: 3, kind: input, shape index: {}]   ;;  %s1268_s4 = inlined_call_operand.vmem [shape: f32[2,8], index: 4, kind: input, shape index: {}]   ;;  %s1269_s5 = inlined_call_operand.hbm [shape: bf16[16,128], index: 5, kind: input, shape index: {}]   ;;  %s1270_s6 = inlined_call_operand.vmem [shape: bf16[32,128], index: 6, kind: input, shape index: {}]   ;;  %s1271_s7 = inlined_call_operand.hbm [shape: f32[1,128], index: 7, kind: input, shape index: {}]   ;;  %s1272_s8 = inlined_call_operand.vmem [shape: bf16[32,128], index: 8, kind: input, shape index: {}]   ;;  %s1273_s9 = inlined_call_operand.vmem [shape: bf16[32,128], index: 9, kind: input, shape index: {}]   ;;  %s1274_s10 = inlined_call_operand.vmem [shape: f32[1,128], index: 10, kind: input, shape index: {}]   ;;  %s1275_s11 = inlined_call_operand.hbm [shape: bf16[32,32], index: 11, kind: input, shape index: {}]   ;;  %s1276_s12 = inlined_call_operand.hbm [shape: bf16[32,32], index: 12, kind: input, shape index: {}]   ;;  %s1277_s13 = inlined_call_operand.hbm [shape: f32[1,32], index: 13, kind: input, shape index: {}]   ;;  %s1278_s14 = inlined_call_operand.vmem [shape: f32[1,32], index: 14, kind: input, shape index: {}]   ;;  %s1279_s15 = inlined_call_operand.hbm [shape: f32[2,2,32], index: 15, kind: output, shape index: {0}]   ;;  %s1280_s16 = inlined_call_operand.hbm [shape: f32[2,2,32], index: 16, kind: output, shape index: {1}]   ;;  %s1281_s17 = inlined_call_operand.hbm [shape: f32[2,8], index: 17, kind: output, shape index: {2}]   ;;  %s1282_s18 = inlined_call_operand.vmem [shape: f32[2,64], index: 18, kind: output, shape index: {3}]  }
   0x1   :  { %1285 = sst [smem:[#allocation20_spill]] %s1264_s0 }
   0x2   :  { %1286 = sst [smem:[#allocation21_spill]] %s1265_s1 }
   0x3   :  { %1287 = sst [smem:[#allocation22_spill]] %s1266_s2 }
   0x4   :  { %24 = vsyncpa [#allocation3], 0 }
   0x5   :  { %25 = vsyncpa [#allocation6], 0 }
   0x6   :  { %26 = vsyncpa [#allocation9], 0 }
   0x7   :  { %27 = vsyncpa [#allocation4], 0  ;;  %s59_s29 = sshll.u32 %s1271_s7, 4  ;;  %s60_s29 = int_to_ptr.hbm [resolvable:$true] %s59_s29 }
   0x8   :  { %28 = vsyncpa [#allocation13], 0  ;;  %s997_s30 = smov [#allocation5]   ;;  %s88_s20 = sshll.u32 %s1276_s12, 4  ;;  %s89_s20 = int_to_ptr.hbm [resolvable:$true] %s88_s20 }
   0x9   :  { %s61_s0 = sshll.u32 %s997_s30, 4  ;;  %s998_s21 = smov [#allocation8]   ;;  %s62_s0 = int_to_ptr.vmem [resolvable:$true] %s61_s0 }
   0xa   :  { %64 = dma.hbm_to_vmem [thread:$0]  %s60_s29, 16, %s62_s0, [#allocation6]  }
   0xb   :  { %s90_s22 = sshll.u32 %s998_s21, 4  ;;  %s43_s24 = sshll.u32 %s1269_s5, 4  ;;  %s91_s22 = int_to_ptr.vmem [resolvable:$true] %s90_s22  ;;  %s44_s24 = int_to_ptr.hbm [resolvable:$true] %s43_s24 }
   0xc   :  { %s999_s7 = smov 64   ;;  %s1000_s25 = smov 4  }
   0xd   :  { %96 = dma.hbm_to_vmem [thread:$0]  %s89_s20, 256, %s91_s22, [#allocation9], %s999_s7, %s999_s7, %s1000_s25  }
   0xe   :  { %s75_s28 = sshll.u32 %s1275_s11, 4  ;;  %s1001_s29 = smov [#allocation2]   ;;  %s76_s28 = int_to_ptr.hbm [resolvable:$true] %s75_s28 }
   0xf   :  { %s45_s12 = sshll.u32 %s1001_s29, 4  ;;  %s1002_s30 = smov [#allocation7]   ;;  %s46_s12 = int_to_ptr.vmem [resolvable:$true] %s45_s12 }
  0x10   :  { %51 = dma.hbm_to_vmem [thread:$0]  %s44_s24, 128, %s46_s12, [#allocation3], %s999_s7, %s999_s7, %s1000_s25  }
  0x11   :  { %s77_s5 = sshll.u32 %s1002_s30, 4  ;;  %s102_s1 = sshll.u32 %s1277_s13, 4  ;;  %s78_s5 = int_to_ptr.vmem [resolvable:$true] %s77_s5  ;;  %s103_s1 = int_to_ptr.hbm [resolvable:$true] %s102_s1 }
  0x12   :  { %83 = dma.hbm_to_vmem [thread:$0]  %s76_s28, 256, %s78_s5, [#allocation6], %s999_s7, %s999_s7, %s1000_s25  }
  0x13   :  { %s1003_s20 = smov [#allocation10]  }
  0x14   :  { %s104_s11 = sshll.u32 %s1003_s20, 4  ;;  %s105_s11 = int_to_ptr.vmem [resolvable:$true] %s104_s11 }
  0x15   :  { %107 = dma.hbm_to_vmem [thread:$0]  %s103_s1, 16, %s105_s11, [#allocation9]  }
  0x16   :  { %987 = dma.done.wait [#allocation3], 128  }
  0x17   :  { %988 = vsyncadd [#allocation3], 4294967168 }
  0x18   :  { %989 = dma.done.wait [#allocation6], 272  }
  0x19   :  { %990 = vsyncadd [#allocation6], 4294967024 }
  0x1a   :  { %991 = dma.done.wait [#allocation9], 272  }
  0x1b   :  { %992 = vsyncadd [#allocation9], 4294967024  ;;  %v736_v0 = vld [vmem:[%s1270_s6 + $0x8] sm:$0xff]  ;;  %v734_v1 = vld [vmem:[#allocation2] sm:$0xff]  ;;  %s1288_s23 = sld [smem:[#allocation20_spill]]  ;;  %vm178_vm0 = vcmask 130048  }
  0x1c   :  { %v735_v4 = vld [vmem:[%s1270_s6] sm:$0xff]  ;;  %s1289_s28 = sld [smem:[#allocation21_spill]]  ;;  %165 = vmatpush.bf16.msra.mxu0 %v736_v0  ;;  %189 = vmatpush.bf16.msra.mxu1 %v734_v1  ;;  %vm155_vm1 = vcmask 261120   ;;  %v763_v8 = vld [vmem:[#allocation5] ss:$0 sm:$0xff]  ;;  %s1004_s30 = smov 32  }
  0x1d   :  { %s1290_s12 = sld [smem:[#allocation22_spill]]  ;;  %v740_v36 = vld [vmem:[%s1273_s9 + $0x8] sm:$0xff]  ;;  %v739_v38 = vld [vmem:[%s1273_s9] sm:$0xff]  ;;  %vm514_vm10 = vcmask 1041409   ;;  %vm517_vm11 = vcmask 58368   ;;  %vm244_vm12 = vcmask 254976  }
  0x1e   :  { %v738_v37 = vld [vmem:[%s1272_s8 + $0x8] sm:$0xff]  ;;  %287 = vmatpush.bf16.msra.mxu2 %v740_v36  ;;  %v737_v40 = vld [vmem:[%s1272_s8] sm:$0xff]  ;;  %s1007_s6 = smov [#allocation12]   ;;  %s641_s0 = sshll.u32 %s1280_s16, 4  ;;  %s642_s0 = int_to_ptr.hbm [resolvable:$true] %s641_s0 }
  0x1f   :  { %318 = vmatpush.bf16.msra.mxu3 %v738_v37  ;;  %v764_v49 = vld [vmem:[%s1274_s10] ss:$0 sm:$0xff]  ;;  %s639_s29 = sshll.u32 %s1007_s6, 4  ;;  %s655_s20 = sshll.u32 %s1281_s17, 4  ;;  %s640_s29 = int_to_ptr.vmem [resolvable:$true] %s639_s29  ;;  %s656_s20 = int_to_ptr.hbm [resolvable:$true] %s655_s20 }
  0x20   :  { %166 = vmatpush.bf16.msra.mxu0 %v735_v4  ;;  %s1008_s11 = smov [#allocation14]   ;;  %s1009_s16 = smov 2  }
  0x21   :  { %v131_v2 = vld [vmem:[%s1288_s23] sm:$0x3]  ;;  %s653_s21 = sshll.u32 %s1008_s11, 4  ;;  %s1010_s22 = smov [#allocation11]   ;;  %s654_s21 = int_to_ptr.vmem [resolvable:$true] %s653_s21 }
  0x22   :  { %v141_v3 = vpack.c.bf16 %v131_v2, %v131_v2  ;;  %v139_v5 = vld [vmem:[%s1289_s28] sm:$0x3]  ;;  %v695_v39 = vld [vmem:[%s1289_s28 + $0x2] sm:$0x3]  ;;  %288 = vmatpush.bf16.msra.mxu2 %v739_v38  ;;  %s626_s13 = sshll.u32 %s1010_s22, 4  ;;  %s628_s9 = sshll.u32 %s1279_s15, 4  ;;  %s627_s13 = int_to_ptr.vmem [resolvable:$true] %s626_s13  ;;  %s629_s9 = int_to_ptr.hbm [resolvable:$true] %s628_s9 }
  0x23   :  { %v142_v6 = vpack.c.bf16 %v139_v5, %v139_v5  ;;  %v140_v15 = vld [vmem:[%s1290_s12] sm:$0x3]  ;;  %v265_v41 = vpack.c.bf16 %v695_v39, %v695_v39  ;;  %319 = vmatpush.bf16.msra.mxu3 %v737_v40  ;;  %v696_v45 = vld [vmem:[%s1290_s12 + $0x2] sm:$0x3] }
  0x24   :  { %693 = vmatmul.msk.bf16.vlgmr.msra.gmra.mxu1 %vm178_vm0, %v141_v3  ;;  %v766_v40 = vld [vmem:[%s1278_s14] ss:$0 sm:$0xff]  ;;  %s1006_s14 = smov 96  }
  0x25   :  { %688 = vmatmul.msk.bf16.vlgmr.msra.gmra.mxu0 %vm155_vm1, %v142_v6  ;;  %705 = vmatmul.msk.bf16.vlgmr.msra.gmra.mxu2 %vm155_vm1, %v265_v41 }
  0xa1   :  { %v191_v7 = vpop.f32.mrf.mxu1 }
  0xa2   :  { %v168_v9 = vpop.f32.mrf.mxu0 }
  0xa3   :  { %v192_v10 = vadd.f32 %v191_v7, %v168_v9 }
  0xa5   :  { %v198_v11 = vadd.f32 %v763_v8, %v192_v10 }
  0xa7   :  { %767 = vtanh.f32 %v198_v11  ;;  %v694_v16 = vmul.f32 -1.442695, %v198_v11  ;;  %v742_v11 = vld [vmem:[#allocation7 + $0x8] sm:$0xff] }
  0xa8   :  { %v290_v47 = vpop.f32.mrf.mxu2  ;;  %417 = vmatpush.bf16.msrb.mxu1 %v742_v11 }
  0xa9   :  { %v193_v12 = vpop.f32.mrf.mxu1  ;;  %769 = vpow2.f32 %v694_v16  ;;  %v1193_v16 = vld [vmem:[%s1267_s3 + $0x8] sm:$0xff] }
  0xaa   :  { %v170_v13 = vpop.f32.mrf.mxu0  ;;  %v744_v12 = vld [vmem:[#allocation8 + $0x8] sm:$0xff] }
  0xab   :  { %v743_v13 = vld [vmem:[#allocation8] sm:$0xff]  ;;  %446 = vmatpush.bf16.msrb.mxu0 %v744_v12 }
  0xad   :  { %v768_v14 = vpop.eup %767 }
  0xae   :  { %225 = vrot.lane.b32.xlu0 %v768_v14, %s999_s7  ;;  %v741_v14 = vld [vmem:[#allocation7] sm:$0xff] }
  0xaf   :  { %v770_v17 = vpop.eup %769  ;;  %447 = vmatpush.bf16.msrb.mxu0 %v743_v13  ;;  %418 = vmatpush.bf16.msrb.mxu1 %v741_v14 }
  0xb0   :  { %v202_v18 = vadd.f32 1.0, %v770_v17  ;;  %v292_v48 = vpop.f32.mrf.mxu2 }
  0xb1   :  { %v1005_v48 = vmov 0  }
  0xb2   :  { %771 = vrcp.f32 %v202_v18  ;;  %v214_v24 = vand.u32 2147483648, %v202_v18  ;;  %vm208_vm3 = vweird.f32 %v202_v18  ;;  %v212_v25 = vand.u32 2147483647, %v202_v18  ;;  %761 = vset.pattern.permute.xlu2 %v1005_v48  ;;  %762 = vset.pattern.permute.xlu1 %v1005_v48 }
  0xb4   :  { %v215_v27 = vor.u32 1.1754944e-38, %v214_v24  ;;  %vm213_vm5 = vcmp.eq.f32.partialorder %v212_v25, 8.507059e+37  ;;  %v482_v24 = vld [vmem:[%s1268_s4] sm:$0x3] }
  0xb5   :  { %v484_v25 = vperm.slane %v482_v24, 0 }
  0xb6   :  { %220 = vrot.lane.b32.xlu0 %v140_v15, %s1004_s30  ;;  %v1188_v15 = vld [vmem:[%s1267_s3] sm:$0xff] }
  0xb7   :  { %v424_v17 = vpack.c.bf16 %v1193_v16, %v1188_v15 }
  0xb8   :  { %v772_v19 = vpop.eup %771 }
  0xb9   :  { %v204_v20 = vmul.f32 %v772_v19, %v202_v18  ;;  %vm209_vm2 = vweird.f32 %v772_v19  ;;  %733 = vmatmul.msk.bf16.vlgmr.msrb.gmra.mxu0 %vm155_vm1, %v424_v17 }
  0xba   :  { %vm210_vm4 = vmor %vm208_vm3, %vm209_vm2 }
  0xbb   :  { %v205_v21 = vsub.f32 1.0, %v204_v20 }
  0xbd   :  { %v206_v22 = vmul.f32 %v772_v19, %v205_v21 }
  0xbe   :  { %350 = vrot.lane.b32.xlu0 %v696_v45, %s1004_s30 }
  0xbf   :  { %v207_v23 = vadd.f32 %v772_v19, %v206_v22  ;;  %v485_v22 = vlaneseq }
  0xc1   :  { %v211_v26 = vsel %vm210_vm4, %v772_v19, %v207_v23  ;;  %v486_v23 = vshrl.u32 %v485_v22, 7 }
  0xc2   :  { %v216_v29 = vsel %vm213_vm5, %v215_v27, %v211_v26  ;;  %v491_v26 = vperm.slane %v482_v24, 1 }
  0xc3   :  { %759 = vset.pattern.permute.xlu0 %v486_v23 }
 0x120   :  { %v226_v28 = vpop.permute.xlu0 %225 }
 0x121   :  { %v228_v30 = vmul.f32 %v226_v28, %v216_v29 }
 0x123   :  { %230 = vrot.lane.b32.xlu1 %v228_v30, %s1004_s30 }
 0x128   :  { %v221_v31 = vpop.permute.xlu0 %220 }
 0x129   :  { %v223_v32 = vmul.f32 %v221_v31, %v216_v29  ;;  %v765_v31 = vld [vmem:[#allocation10] ss:$0 sm:$0xff] }
 0x130   :  { %v351_v6 = vpop.permute.xlu0 %350 }
 0x136   :  { %v449_v27 = vpop.f32.mrf.mxu0 }
 0x195   :  { %v231_v33 = vpop.permute.xlu1 %230 }
 0x196   :  { %v1146_v34 = vadd.f32 %v231_v33, %v223_v32 }
 0x198   :  { %773 = vtanh.f32 %v1146_v34 }
 0x19e   :  { %v774_v35 = vpop.eup %773 }
 0x19f   :  { %236 = vrot.lane.b32.xlu1 %v774_v35, %s999_s7  ;;  %v451_v35 = vpop.f32.mrf.mxu0 }
 0x211   :  { %v237_v42 = vpop.permute.xlu1 %236 }
 0x212   :  { %v1166_v43 = vmul.f32 %v237_v42, %v216_v29 }
 0x214   :  { %v264_v44 = vpack.c.bf16 %v1166_v43, %v1166_v43 }
 0x216   :  { %295 = vrot.lane.b32.xlu2 %v264_v44, %s1004_s30 }
 0x270   :  { %v296_v46 = vpop.permute.xlu2 %295 }
 0x271   :  { %714 = vmatmul.msk.bf16.vlgmr.msra.gmra.mxu3 %vm155_vm1, %v296_v46 }
 0x2f4   :  { %v321_v50 = vpop.f32.mrf.mxu3 }
 0x2f5   :  { %v322_v51 = vadd.f32 %v321_v50, %v290_v47 }
 0x2f7   :  { %v328_v52 = vadd.f32 %v764_v49, %v322_v51 }
 0x2f9   :  { %775 = vtanh.f32 %v328_v52  ;;  %v715_v55 = vmul.f32 -1.442695, %v328_v52 }
 0x2fb   :  { %777 = vpow2.f32 %v715_v55  ;;  %v1212_v55 = vand.u32 127, %v485_v22 }
 0x2fc   :  { %v323_v53 = vpop.f32.mrf.mxu3 }
 0x2ff   :  { %v776_v54 = vpop.eup %775 }
 0x300   :  { %355 = vrot.lane.b32.xlu2 %v776_v54, %s999_s7 }
 0x301   :  { %v778_v56 = vpop.eup %777 }
 0x302   :  { %v332_v57 = vadd.f32 1.0, %v778_v56 }
 0x304   :  { %779 = vrcp.f32 %v332_v57  ;;  %v344_v63 = vand.u32 2147483648, %v332_v57  ;;  %vm338_vm7 = vweird.f32 %v332_v57  ;;  %v342_v0 = vand.u32 2147483647, %v332_v57 }
 0x306   :  { %v345_v2 = vor.u32 1.1754944e-38, %v344_v63  ;;  %vm343_vm9 = vcmp.eq.f32.partialorder %v342_v0, 8.507059e+37 }
 0x30a   :  { %v780_v58 = vpop.eup %779 }
 0x30b   :  { %v334_v59 = vmul.f32 %v780_v58, %v332_v57  ;;  %vm339_vm6 = vweird.f32 %v780_v58 }
 0x30c   :  { %vm340_vm8 = vmor %vm338_vm7, %vm339_vm6 }
 0x30d   :  { %v335_v60 = vsub.f32 1.0, %v334_v59 }
 0x30f   :  { %v336_v61 = vmul.f32 %v780_v58, %v335_v60 }
 0x311   :  { %v337_v62 = vadd.f32 %v780_v58, %v336_v61 }
 0x313   :  { %v341_v1 = vsel %vm340_vm8, %v780_v58, %v337_v62 }
 0x314   :  { %v346_v3 = vsel %vm343_vm9, %v345_v2, %v341_v1 }
 0x315   :  { %v353_v7 = vmul.f32 %v351_v6, %v346_v3 }
 0x35a   :  { %v356_v4 = vpop.permute.xlu2 %355 }
 0x35b   :  { %v358_v5 = vmul.f32 %v356_v4, %v346_v3 }
 0x35d   :  { %360 = vrot.lane.b32.xlu1 %v358_v5, %s1004_s30 }
 0x3cf   :  { %v361_v8 = vpop.permute.xlu1 %360 }
 0x3d0   :  { %v1181_v9 = vadd.f32 %v361_v8, %v353_v7 }
 0x3d2   :  { %781 = vtanh.f32 %v1181_v9 }
 0x3d8   :  { %v782_v10 = vpop.eup %781 }
 0x3d9   :  { %366 = vrot.lane.b32.xlu2 %v782_v10, %s999_s7 }
 0x433   :  { %v367_v18 = vpop.permute.xlu2 %366 }
 0x434   :  { %v1198_v19 = vmul.f32 %v367_v18, %v346_v3 }
 0x436   :  { %v392_v20 = vpack.c.bf16 %v1198_v19, %v1198_v19 }
 0x438   :  { %394 = vrot.lane.b32.xlu0 %v392_v20, %s1004_s30 }
 0x440   :  { %489 = vperm.xlu0 %759, %v484_v25  }
 0x448   :  { %496 = vperm.xlu0 %759, %v491_v26  }
 0x450   :  { %760 = vset.pattern.permute.xlu0 %v1005_v48 }
 0x4aa   :  { %v395_v21 = vpop.permute.xlu0 %394 }
 0x4ab   :  { %724 = vmatmul.msk.bf16.vlgmr.msrb.gmra.mxu1 %vm155_vm1, %v395_v21 }
 0x4b2   :  { %v490_v49 = vpop.permute.xlu0 %489 }
 0x4ba   :  { %v497_v52 = vpop.permute.xlu0 %496 }
 0x528   :  { %v420_v28 = vpop.f32.mrf.mxu1 }
 0x529   :  { %v455_v29 = vrot.slane %v420_v28, 1  ;;  %v456_v30 = vperm.slane %v420_v28, 0 }
 0x52b   :  { %v457_v32 = vperm.slane %v455_v29, 0  ;;  %v460_v33 = vadd.f32 %v456_v30, %v449_v27 }
 0x52d   :  { %v461_v36 = vadd.f32 %v457_v32, %v451_v35  ;;  %v466_v37 = vadd.f32 %v765_v31, %v460_v33 }
 0x52f   :  { %v467_v38 = vadd.f32 %v765_v31, %v461_v36  ;;  %783 = vtanh.f32 %v466_v37 }
 0x530   :  { %v422_v39 = vpop.f32.mrf.mxu1 }
 0x531   :  { %785 = vtanh.f32 %v467_v38 }
 0x535   :  { %v784_v41 = vpop.eup %783 }
 0x536   :  { %v474_v42 = vmul.f32 %v784_v41, %v766_v40 }
 0x537   :  { %v786_v44 = vpop.eup %785 }
 0x538   :  { %v476_v45 = vsel %vm155_vm1, %v474_v42, 0.0  ;;  %v475_v46 = vmul.f32 %v786_v44, %v766_v40 }
 0x539   :  { %477 = vadd.xlane.f32.xlu1 %v476_v45 }
 0x53a   :  { %v479_v47 = vsel %vm155_vm1, %v475_v46, 0.0 }
 0x53b   :  { %480 = vadd.xlane.f32.xlu2 %v479_v47 }
 0x5ac   :  { %v478_v50 = vpop.xlane.xlu1 %477 }
 0x5ad   :  { %v500_v51 = vadd.f32 %v490_v49, %v478_v50 }
 0x5ae   :  { %v481_v53 = vpop.xlane.xlu2 %480 }
 0x5af   :  { %v501_v54 = vadd.f32 %v497_v52, %v481_v53  ;;  %505 = vperm.xlu0 %760, %v500_v51  }
 0x5b1   :  { %508 = vperm.xlu2 %761, %v501_v54  }
 0x60b   :  { %v509_v56 = vpop.permute.xlu2 %508 }
 0x60c   :  { %v513_v58 = vperm.slane %v509_v56, %v1212_v55 }
 0x621   :  { %v506_v57 = vpop.permute.xlu0 %505 }
 0x622   :  { %v512_v59 = vperm.slane %v506_v57, %v1212_v55 }
 0x624   :  { %v515_v60 = vsel %vm514_vm10, %v513_v58, %v512_v59 }
 0x625   :  { %v518_v61 = vsel %vm517_vm11, %v515_v60, -inf }
 0x626   :  { %519 = vmax.xlane.f32.xlu1 %v518_v61 }
 0x699   :  { %v520_v62 = vpop.xlane.xlu1 %519 }
 0x69a   :  { %v522_v63 = vperm.slane %v520_v62, 0  ;;  %v523_v0 = vperm.slane %v520_v62, 1 }
 0x69c   :  { %v526_v1 = vsub.f32 %v500_v51, %v522_v63  ;;  %v527_v2 = vsub.f32 %v501_v54, %v523_v0 }
 0x69e   :  { %v528_v3 = vmul.f32 1.442695, %v526_v1  ;;  %v530_v4 = vmul.f32 1.442695, %v527_v2 }
 0x6a0   :  { %787 = vpow2.f32 %v528_v3 }
 0x6a1   :  { %789 = vpow2.f32 %v530_v4 }
 0x6a6   :  { %v788_v5 = vpop.eup %787 }
 0x6a7   :  { %v790_v6 = vpop.eup %789  ;;  %535 = vperm.xlu0 %760, %v788_v5  }
 0x6a8   :  { %538 = vperm.xlu1 %762, %v790_v6  }
 0x6b0   :  { %247 = vrot.lane.b32.xlu1 %v1146_v34, %s1006_s14 }
 0x6b8   :  { %241 = vrot.lane.b32.xlu1 %v1166_v43, %s1004_s30 }
 0x719   :  { %v536_v7 = vpop.permute.xlu0 %535 }
 0x71a   :  { %v539_v8 = vpop.permute.xlu1 %538  ;;  %v540_v10 = vperm.slane %v536_v7, %v1212_v55 }
 0x71b   :  { %v541_v11 = vperm.slane %v539_v8, %v1212_v55 }
 0x71d   :  { %v542_v12 = vsel %vm514_vm10, %v541_v11, %v540_v10 }
 0x71e   :  { %v544_v13 = vsel %vm517_vm11, %v542_v12, 0.0 }
 0x71f   :  { %545 = vadd.xlane.f32.xlu0 %v544_v13 }
 0x722   :  { %v248_v14 = vpop.permute.xlu1 %247 }
 0x723   :  { %250 = vst.msk [vmem:[#allocation12] sm:$0x3] %vm244_vm12, %v248_v14 }
 0x72a   :  { %v242_v17 = vpop.permute.xlu1 %241 }
 0x72b   :  { %245 = vst.msk [vmem:[#allocation11] sm:$0x3] %vm244_vm12, %v242_v17 }
 0x792   :  { %v546_v34 = vpop.xlane.xlu0 %545 }
 0x793   :  { %v548_v43 = vperm.slane %v546_v34, 0  ;;  %v549_v18 = vperm.slane %v546_v34, 1 }
 0x795   :  { %791 = vrcp.f32 %v548_v43  ;;  %v563_v26 = vand.u32 2147483648, %v548_v43  ;;  %v561_v28 = vand.u32 2147483647, %v548_v43  ;;  %vm557_vm14 = vweird.f32 %v548_v43 }
 0x796   :  { %793 = vrcp.f32 %v549_v18  ;;  %v578_v36 = vand.u32 2147483648, %v549_v18  ;;  %vm572_vm3 = vweird.f32 %v549_v18  ;;  %v576_v38 = vand.u32 2147483647, %v549_v18 }
 0x797   :  { %v564_v31 = vor.u32 1.1754944e-38, %v563_v26  ;;  %vm562_vm0 = vcmp.eq.f32.partialorder %v561_v28, 8.507059e+37 }
 0x798   :  { %v579_v40 = vor.u32 1.1754944e-38, %v578_v36  ;;  %vm577_vm5 = vcmp.eq.f32.partialorder %v576_v38, 8.507059e+37 }
 0x79b   :  { %v792_v20 = vpop.eup %791 }
 0x79c   :  { %v794_v21 = vpop.eup %793  ;;  %v553_v22 = vmul.f32 %v792_v20, %v548_v43  ;;  %vm558_vm13 = vweird.f32 %v792_v20 }
 0x79d   :  { %v568_v23 = vmul.f32 %v794_v21, %v549_v18  ;;  %vm559_vm15 = vmor %vm557_vm14, %vm558_vm13  ;;  %vm573_vm2 = vweird.f32 %v794_v21 }
 0x79e   :  { %v554_v24 = vsub.f32 1.0, %v553_v22  ;;  %vm574_vm4 = vmor %vm572_vm3, %vm573_vm2 }
 0x79f   :  { %v569_v25 = vsub.f32 1.0, %v568_v23 }
 0x7a0   :  { %v555_v27 = vmul.f32 %v792_v20, %v554_v24 }
 0x7a1   :  { %v570_v29 = vmul.f32 %v794_v21, %v569_v25 }
 0x7a2   :  { %v556_v30 = vadd.f32 %v792_v20, %v555_v27 }
 0x7a3   :  { %v571_v33 = vadd.f32 %v794_v21, %v570_v29 }
 0x7a4   :  { %v560_v32 = vsel %vm559_vm15, %v792_v20, %v556_v30 }
 0x7a5   :  { %v565_v35 = vsel %vm562_vm0, %v564_v31, %v560_v32  ;;  %v575_v39 = vsel %vm574_vm4, %v794_v21, %v571_v33 }
 0x7a6   :  { %v566_v37 = vmul.f32 %v788_v5, %v565_v35  ;;  %v580_v41 = vsel %vm577_vm5, %v579_v40, %v575_v39 }
 0x7a7   :  { %v581_v42 = vmul.f32 %v790_v6, %v580_v41 }
 0x7a8   :  { %585 = vperm.xlu2 %761, %v566_v37  }
 0x7b0   :  { %588 = vperm.xlu2 %761, %v581_v42  }
 0x7b8   :  { %377 = vrot.lane.b32.xlu2 %v1181_v9, %s1006_s14 }
 0x7c0   :  { %371 = vrot.lane.b32.xlu2 %v1198_v19, %s1004_s30 }
 0x802   :  { %v586_v44 = vpop.permute.xlu2 %585 }
 0x803   :  { %v597_v45 = vmul.f32 %v586_v44, %v1188_v15  ;;  %v590_v50 = vperm.slane %v586_v44, %v1212_v55 }
 0x805   :  { %v599_v46 = vsel %vm155_vm1, %v597_v45, 0.0 }
 0x806   :  { %v600_v47 = vrot.slane %v599_v46, 4 }
 0x808   :  { %v601_v48 = vadd.f32 %v600_v47, %v599_v46 }
 0x80a   :  { %v589_v49 = vpop.permute.xlu2 %588  ;;  %v602_v53 = vrot.slane %v601_v48, 2 }
 0x80b   :  { %v591_v51 = vperm.slane %v589_v49, %v1212_v55  ;;  %v598_v52 = vmul.f32 %v589_v49, %v1193_v16 }
 0x80c   :  { %v603_v19 = vadd.f32 %v602_v53, %v601_v48 }
 0x80d   :  { %v592_v9 = vsel %vm514_vm10, %v591_v51, %v590_v50  ;;  %v606_v54 = vsel %vm155_vm1, %v598_v52, 0.0  ;;  %vm620_vm1 = vcmask 517376  }
 0x80e   :  { %v607_v15 = vrot.slane %v606_v54, 4  ;;  %594 = vst.msk [vmem:[#allocation14] sm:$0x3] %vm517_vm11, %v592_v9  ;;  %v604_v58 = vrot.slane %v603_v19, 1 }
 0x810   :  { %v608_v56 = vadd.f32 %v607_v15, %v606_v54  ;;  %v605_v60 = vadd.f32 %v604_v58, %v603_v19 }
 0x812   :  { %v609_v16 = vrot.slane %v608_v56, 2  ;;  %v378_v55 = vpop.permute.xlu2 %377 }
 0x813   :  { %381 = vst.msk [vmem:[#allocation12 + $0x2] sm:$0x3] %vm244_vm12, %v378_v55 }
 0x814   :  { %v610_v57 = vadd.f32 %v609_v16, %v608_v56  ;;  %647 = dma.vmem_to_hbm [thread:$0]  %s640_s29, 64, %s642_s0, [#allocation13], %s1004_s30, %s1004_s30, %s1009_s16  }
 0x815   :  { %658 = dma.vmem_to_hbm [thread:$0]  %s654_s21, 32, %s656_s20, [#allocation13]  }
 0x816   :  { %v611_v59 = vrot.slane %v610_v57, 1 }
 0x818   :  { %v612_v61 = vadd.f32 %v611_v59, %v610_v57 }
 0x81a   :  { %v372_v62 = vpop.permute.xlu2 %371  ;;  %v616_v63 = vsel %vm514_vm10, %v612_v61, %v605_v60 }
 0x81b   :  { %375 = vst.msk [vmem:[#allocation11 + $0x2] sm:$0x3] %vm244_vm12, %v372_v62  ;;  %617 = vrot.lane.b32.xlu1 %v616_v63, %s1004_s30 }
 0x81c   :  { %613 = vst.msk [vmem:[%s1282_s18] sm:$0x3] %vm244_vm12, %v372_v62 }
 0x81d   :  { %634 = dma.vmem_to_hbm [thread:$0]  %s627_s13, 64, %s629_s9, [#allocation4], %s1004_s30, %s1004_s30, %s1009_s16  }
 0x88d   :  { %v618_v0 = vpop.permute.xlu1 %617 }
 0x88e   :  { %621 = vst.msk [vmem:[%s1282_s18] sm:$0x3] %vm620_vm1, %v618_v0 }
 0x88f   :  { %993 = dma.done.wait [#allocation4], 64  }
 0x890   :  { %994 = vsyncadd [#allocation4], 4294967232 }
 0x891   :  { %995 = dma.done.wait [#allocation13], 96  }
 0x892   :  { %996 = vsyncadd [#allocation13], 4294967200 }
 0x893   :  { %675 = vsyncpa [#allocation3], 1 }
 0x894   :  { %676 = vsyncpa [#allocation6], 1 }
 0x895   :  { %677 = vsyncpa [#allocation9], 1 }
 0x896   :  { %678 = vsyncpa [#allocation4], 1 }
 0x897   :  { %679 = vsyncpa [#allocation13], 1 }

</bundles_post_ra>
